<compile_context>
chip_gen: v7x
topology: tpu7x:2x2x1
jax: 0.10.0
libtpu: 0.0.40
codegen_flags: <defaults>
</compile_context>

<pallas_src>
import functools

import jax
import jax.numpy as jnp
from jax.experimental import pallas as pl
from jax.experimental.pallas import tpu as pltpu

INPUT_SIZE = 784
LAYER1_SIZE = 128
LAYER2_SIZE = 64
OUTPUT_SIZE = 10
L2_PAD = 128    # layer-2 width padded to full MXU/vreg lanes
OUT_PAD = 128   # lane-dense output width (>= OUTPUT_SIZE, multiple of 128)


def mlp_kernel(x_ref, w1_ref, b1_ref, w2_ref, b2_ref, w3_ref, b3_ref, o_ref):
    # x arrives as f32 straight from HBM; cast to bf16 here (no wrapper pass).
    x = x_ref[...].astype(jnp.bfloat16)
    # layer 1: bf16 x @ bf16 W1 -> f32 accumulate; bias + ReLU in f32
    h1 = jnp.dot(x, w1_ref[...], preferred_element_type=jnp.float32)
    h1 = jnp.maximum(h1 + b1_ref[...], 0.0)
    # layer 2 (padded to 128 lanes): cast activation to bf16 only for the MXU feed
    h2 = jnp.dot(h1.astype(jnp.bfloat16), w2_ref[...],
                 preferred_element_type=jnp.float32)
    h2 = jnp.maximum(h2 + b2_ref[...], 0.0)
    # layer 3: output padded to 128 lanes -> unmasked lane-dense bf16 store
    out = jnp.dot(h2.astype(jnp.bfloat16), w3_ref[...],
                  preferred_element_type=jnp.float32)
    o_ref[...] = (out + b3_ref[...]).astype(o_ref.dtype)


def prepare_params(w1, b1, w2, b2, w3, b3):
    """One-time cast/pad of weights to their kernel dtypes/layouts (stored as (in, out))."""
    w1_b = w1.astype(jnp.bfloat16)                                        # (784, 128)
    b1_r = b1.reshape(1, LAYER1_SIZE).astype(jnp.float32)                 # (1, 128)
    w2_b = jnp.pad(w2, ((0, 0), (0, L2_PAD - LAYER2_SIZE))).astype(jnp.bfloat16)   # (128, 128)
    b2_r = jnp.pad(b2, (0, L2_PAD - LAYER2_SIZE)).reshape(1, L2_PAD).astype(jnp.float32)
    w3_b = jnp.pad(w3, ((0, L2_PAD - LAYER2_SIZE),
                        (0, OUT_PAD - OUTPUT_SIZE))).astype(jnp.bfloat16)           # (128, 128)
    b3_r = jnp.pad(b3, (0, OUT_PAD - OUTPUT_SIZE)).reshape(1, OUT_PAD).astype(jnp.float32)
    return (w1_b, b1_r, w2_b, b2_r, w3_b, b3_r)


def _pick_tm(batch, target):
    """Batch tile: multiple of 8 sublanes. Small batches get one exact tile
    (no over-padding); large batches use `target`, which gives >= 2 grid steps
    so the 'parallel' batch axis can feed both v7x TensorCores."""
    b8 = ((batch + 7) // 8) * 8
    return b8 if b8 <= target else target


@functools.partial(jax.jit, static_argnames=("tm_target",))
def classifier_forward(x, params, *, tm_target=512):
    """x: (B, 784) f32; params from prepare_params; returns (B, 10) f32 logits."""
    w1_b, b1_r, w2_b, b2_r, w3_b, b3_r = params
    B = x.shape[0]
    tm = _pick_tm(B, tm_target)
    n_tiles = pl.cdiv(B, tm)
    B_pad = n_tiles * tm
    if B_pad != B:
        x = jnp.pad(x, ((0, B_pad - B), (0, 0)))

    flops = 2 * B_pad * (INPUT_SIZE * LAYER1_SIZE + LAYER1_SIZE * L2_PAD + L2_PAD * OUT_PAD)
    weight_bytes = 2 * (INPUT_SIZE * LAYER1_SIZE + LAYER1_SIZE * L2_PAD + L2_PAD * OUT_PAD) \
                   + 4 * (LAYER1_SIZE + L2_PAD + OUT_PAD)
    bytes_accessed = B_pad * INPUT_SIZE * 4 + B_pad * OUT_PAD * 2 + weight_bytes

    resident = lambda shape: pl.BlockSpec(shape, lambda i: (0, 0))

    out = pl.pallas_call(
        mlp_kernel,
        out_shape=jax.ShapeDtypeStruct((B_pad, OUT_PAD), jnp.bfloat16),
        grid=(n_tiles,),
        in_specs=[
            pl.BlockSpec((tm, INPUT_SIZE), lambda i: (i, 0)),   # x tile (f32), pipelined
            resident((INPUT_SIZE, LAYER1_SIZE)),                # W1 resident (bf16)
            resident((1, LAYER1_SIZE)),                         # b1 (f32)
            resident((LAYER1_SIZE, L2_PAD)),                    # W2 (lane-padded, bf16)
            resident((1, L2_PAD)),                              # b2 (f32, padded)
            resident((L2_PAD, OUT_PAD)),                        # W3 (lane-padded, bf16)
            resident((1, OUT_PAD)),                             # b3 (f32, padded)
        ],
        out_specs=pl.BlockSpec((tm, OUT_PAD), lambda i: (i, 0)),
        compiler_params=pltpu.CompilerParams(
            dimension_semantics=("parallel",),       # shard batch tiles across TCs (v7x)
            vmem_limit_bytes=32 * 1024 * 1024,       # covers v5e's 16 MiB default at tm>=1024
        ),
        cost_estimate=pl.CostEstimate(flops=flops, transcendentals=0,
                                      bytes_accessed=bytes_accessed),
    )(x, w1_b, b1_r, w2_b, b2_r, w3_b, b3_r)

    # TODO(synk): downstream consumers (softmax/argmax/loss) could take the padded
    # (B_pad, 128) bf16 slab directly (or be fused into the kernel epilogue) and
    # skip this slice pass entirely.
    return out[:B, :OUTPUT_SIZE].astype(jnp.float32)


def init_linear(key, in_features, out_features):
    # Mimics torch.nn.Linear's uniform(-1/sqrt(in), 1/sqrt(in)) init.
    kw, kb = jax.random.split(key)
    bound = 1.0 / jnp.sqrt(float(in_features))
    # stored as (in, out) so kernel computes x @ W
    w = jax.random.uniform(kw, (in_features, out_features), jnp.float32, -bound, bound)
    b = jax.random.uniform(kb, (out_features,), jnp.float32, -bound, bound)
    return w, b


if __name__ == "__main__":
    key = jax.random.PRNGKey(0)
    kx, k1, k2, k3 = jax.random.split(key, 4)

    B = 8  # small batch demo
    x = jax.random.normal(kx, (B, INPUT_SIZE), jnp.float32)
    w1, b1 = init_linear(k1, INPUT_SIZE, LAYER1_SIZE)
    w2, b2 = init_linear(k2, LAYER1_SIZE, LAYER2_SIZE)
    w3, b3 = init_linear(k3, LAYER2_SIZE, OUTPUT_SIZE)

    params = prepare_params(w1, b1, w2, b2, w3, b3)   # one-time cast/pad
    out = classifier_forward(x, params)
    out = jax.block_until_ready(out)
    assert out.shape == (B, OUTPUT_SIZE)

    # Reference using the same precision scheme (bf16 MXU operands, f32 accumulate,
    # final bf16 store).
    xb = x.astype(jnp.bfloat16)
    r1 = jnp.maximum(
        jnp.dot(xb, w1.astype(jnp.bfloat16), preferred_element_type=jnp.float32) + b1, 0.0)
    r2 = jnp.maximum(
        jnp.dot(r1.astype(jnp.bfloat16), w2.astype(jnp.bfloat16),
                preferred_element_type=jnp.float32) + b2, 0.0)
    ref = (jnp.dot(r2.astype(jnp.bfloat16), w3.astype(jnp.bfloat16),
                   preferred_element_type=jnp.float32) + b3)
    ref = ref.astype(jnp.bfloat16).astype(jnp.float32)
    assert jnp.allclose(out, ref, atol=2e-2, rtol=2e-2), (
        float(jnp.max(jnp.abs(out - ref))))

    # Sanity vs. full-f32 math (looser tolerance due to bf16 operands / bf16 store).
    f1 = jnp.maximum(x @ w1 + b1, 0.0)
    f2 = jnp.maximum(f1 @ w2 + b2, 0.0)
    f3 = f2 @ w3 + b3
    assert jnp.max(jnp.abs(out - f3)) < 5e-2

    print("KERNEL_OK")
</pallas_src>

<mosaic_0001>
module attributes {stable_mosaic.version = 11 : i64} {
  func.func @mlp_kernel(%arg0: i32, %arg1: memref<8x784xf32, #tpu.memory_space<vmem>>, %arg2: memref<784x128xbf16, #tpu.memory_space<vmem>>, %arg3: memref<1x128xf32, #tpu.memory_space<vmem>>, %arg4: memref<128x128xbf16, #tpu.memory_space<vmem>>, %arg5: memref<1x128xf32, #tpu.memory_space<vmem>>, %arg6: memref<128x128xbf16, #tpu.memory_space<vmem>>, %arg7: memref<1x128xf32, #tpu.memory_space<vmem>>, %arg8: memref<8x128xbf16, #tpu.memory_space<vmem>>) attributes {dimension_semantics = [#tpu.dimension_semantics<parallel>], iteration_bounds = array<i64: 1>, scalar_prefetch = 0 : i64, scratch_operands = 0 : i64, tpu.core_type = #tpu.core_type<tc>, window_params = [{transform_indices = @transform_0, window_bounds = array<i64: 8, 784>}, {pipeline_mode = #tpu.pipeline_mode<synchronous>, transform_indices = @transform_1, window_bounds = array<i64: 784, 128>}, {pipeline_mode = #tpu.pipeline_mode<synchronous>, transform_indices = @transform_2, window_bounds = array<i64: 1, 128>}, {pipeline_mode = #tpu.pipeline_mode<synchronous>, transform_indices = @transform_3, window_bounds = array<i64: 128, 128>}, {pipeline_mode = #tpu.pipeline_mode<synchronous>, transform_indices = @transform_4, window_bounds = array<i64: 1, 128>}, {pipeline_mode = #tpu.pipeline_mode<synchronous>, transform_indices = @transform_5, window_bounds = array<i64: 128, 128>}, {pipeline_mode = #tpu.pipeline_mode<synchronous>, transform_indices = @transform_6, window_bounds = array<i64: 1, 128>}, {transform_indices = @transform_7, window_bounds = array<i64: 8, 128>}]} {
    %c0 = arith.constant 0 : index
    %c0_0 = arith.constant 0 : index
    %0 = vector.load %arg1[%c0, %c0_0] : memref<8x784xf32, #tpu.memory_space<vmem>>, vector<8x784xf32>
    %1 = arith.truncf %0 : vector<8x784xf32> to vector<8x784xbf16>
    %c0_1 = arith.constant 0 : index
    %c0_2 = arith.constant 0 : index
    %2 = vector.load %arg2[%c0_1, %c0_2] : memref<784x128xbf16, #tpu.memory_space<vmem>>, vector<784x128xbf16>
    %cst = arith.constant dense<0.000000e+00> : vector<8x128xf32>
    %3 = tpu.matmul %1, %2, %cst {dimension_numbers = #tpu.dot_dimension_numbers<[1], [0], [0], [1], [0, 0, 1, 1], [], []>} : vector<8x784xbf16>, vector<784x128xbf16>, vector<8x128xf32> -> vector<8x128xf32>
    %c0_3 = arith.constant 0 : index
    %c0_4 = arith.constant 0 : index
    %4 = vector.load %arg3[%c0_3, %c0_4] : memref<1x128xf32, #tpu.memory_space<vmem>>, vector<1x128xf32>
    %5 = vector.broadcast %4 : vector<1x128xf32> to vector<8x128xf32>
    %6 = arith.addf %3, %5 : vector<8x128xf32>
    %cst_5 = arith.constant 0.000000e+00 : f32
    %7 = vector.broadcast %cst_5 : f32 to vector<8x128xf32>
    %8 = arith.maximumf %6, %7 : vector<8x128xf32>
    %9 = arith.truncf %8 : vector<8x128xf32> to vector<8x128xbf16>
    %c0_6 = arith.constant 0 : index
    %c0_7 = arith.constant 0 : index
    %10 = vector.load %arg4[%c0_6, %c0_7] : memref<128x128xbf16, #tpu.memory_space<vmem>>, vector<128x128xbf16>
    %cst_8 = arith.constant dense<0.000000e+00> : vector<8x128xf32>
    %11 = tpu.matmul %9, %10, %cst_8 {dimension_numbers = #tpu.dot_dimension_numbers<[1], [0], [0], [1], [0, 0, 1, 1], [], []>} : vector<8x128xbf16>, vector<128x128xbf16>, vector<8x128xf32> -> vector<8x128xf32>
    %c0_9 = arith.constant 0 : index
    %c0_10 = arith.constant 0 : index
    %12 = vector.load %arg5[%c0_9, %c0_10] : memref<1x128xf32, #tpu.memory_space<vmem>>, vector<1x128xf32>
    %13 = vector.broadcast %12 : vector<1x128xf32> to vector<8x128xf32>
    %14 = arith.addf %11, %13 : vector<8x128xf32>
    %cst_11 = arith.constant 0.000000e+00 : f32
    %15 = vector.broadcast %cst_11 : f32 to vector<8x128xf32>
    %16 = arith.maximumf %14, %15 : vector<8x128xf32>
    %17 = arith.truncf %16 : vector<8x128xf32> to vector<8x128xbf16>
    %c0_12 = arith.constant 0 : index
    %c0_13 = arith.constant 0 : index
    %18 = vector.load %arg6[%c0_12, %c0_13] : memref<128x128xbf16, #tpu.memory_space<vmem>>, vector<128x128xbf16>
    %cst_14 = arith.constant dense<0.000000e+00> : vector<8x128xf32>
    %19 = tpu.matmul %17, %18, %cst_14 {dimension_numbers = #tpu.dot_dimension_numbers<[1], [0], [0], [1], [0, 0, 1, 1], [], []>} : vector<8x128xbf16>, vector<128x128xbf16>, vector<8x128xf32> -> vector<8x128xf32>
    %c0_15 = arith.constant 0 : index
    %c0_16 = arith.constant 0 : index
    %20 = vector.load %arg7[%c0_15, %c0_16] : memref<1x128xf32, #tpu.memory_space<vmem>>, vector<1x128xf32>
    %21 = vector.broadcast %20 : vector<1x128xf32> to vector<8x128xf32>
    %22 = arith.addf %19, %21 : vector<8x128xf32>
    %23 = arith.truncf %22 : vector<8x128xf32> to vector<8x128xbf16>
    %c0_17 = arith.constant 0 : index
    %c0_18 = arith.constant 0 : index
    %24 = vector.load %arg8[%c0_17, %c0_18] : memref<8x128xbf16, #tpu.memory_space<vmem>>, vector<8x128xbf16>
    tpu.vector_store %arg8[%c0_17, %c0_18], %23 {strides = array<i32>} : memref<8x128xbf16, #tpu.memory_space<vmem>>, vector<8x128xbf16>,
    return
  }
  func.func @transform_0(%arg0: i32) -> (i32, i32) {
    %c0_i32 = arith.constant 0 : i32
    %c0_i32_0 = arith.constant 0 : i32
    return %arg0, %c0_i32 : i32, i32
  }
  func.func @transform_1(%arg0: i32) -> (i32, i32) {
    %c0_i32 = arith.constant 0 : i32
    %c0_i32_0 = arith.constant 0 : i32
    %c0_i32_1 = arith.constant 0 : i32
    return %c0_i32, %c0_i32_0 : i32, i32
  }
  func.func @transform_2(%arg0: i32) -> (i32, i32) {
    %c0_i32 = arith.constant 0 : i32
    %c0_i32_0 = arith.constant 0 : i32
    %c0_i32_1 = arith.constant 0 : i32
    return %c0_i32, %c0_i32_0 : i32, i32
  }
  func.func @transform_3(%arg0: i32) -> (i32, i32) {
    %c0_i32 = arith.constant 0 : i32
    %c0_i32_0 = arith.constant 0 : i32
    %c0_i32_1 = arith.constant 0 : i32
    return %c0_i32, %c0_i32_0 : i32, i32
  }
  func.func @transform_4(%arg0: i32) -> (i32, i32) {
    %c0_i32 = arith.constant 0 : i32
    %c0_i32_0 = arith.constant 0 : i32
    %c0_i32_1 = arith.constant 0 : i32
    return %c0_i32, %c0_i32_0 : i32, i32
  }
  func.func @transform_5(%arg0: i32) -> (i32, i32) {
    %c0_i32 = arith.constant 0 : i32
    %c0_i32_0 = arith.constant 0 : i32
    %c0_i32_1 = arith.constant 0 : i32
    return %c0_i32, %c0_i32_0 : i32, i32
  }
  func.func @transform_6(%arg0: i32) -> (i32, i32) {
    %c0_i32 = arith.constant 0 : i32
    %c0_i32_0 = arith.constant 0 : i32
    %c0_i32_1 = arith.constant 0 : i32
    return %c0_i32, %c0_i32_0 : i32, i32
  }
  func.func @transform_7(%arg0: i32) -> (i32, i32) {
    %c0_i32 = arith.constant 0 : i32
    %c0_i32_0 = arith.constant 0 : i32
    return %arg0, %c0_i32 : i32, i32
  }
}

</mosaic_0001>

<bundles_post_ra>
// kernel: classifier_forward.1
= control target key start
LH: loop header
LB: loop body
LE: loop exit
PB: predicated region body
PF: predicated region fallthrough
CT: control target
= control target key end

     0   :  { %12 = vsyncpa [#allocation3], 0  ;;  %s1400_s0 = inlined_call_operand.hbm [shape: f32[8,784], index: 0, kind: input, shape index: {}]   ;;  %s1401_s1 = inlined_call_operand.hbm [shape: bf16[784,128], index: 1, kind: input, shape index: {}]   ;;  %s1402_s2 = inlined_call_operand.vmem [shape: f32[1,128], index: 2, kind: input, shape index: {}]   ;;  %s1403_s3 = inlined_call_operand.hbm [shape: bf16[128,128], index: 3, kind: input, shape index: {}]   ;;  %s1404_s4 = inlined_call_operand.vmem [shape: f32[1,128], index: 4, kind: input, shape index: {}]   ;;  %s1405_s5 = inlined_call_operand.hbm [shape: bf16[128,128], index: 5, kind: input, shape index: {}]   ;;  %s1406_s6 = inlined_call_operand.vmem [shape: f32[1,128], index: 6, kind: input, shape index: {}]   ;;  %s1407_s7 = inlined_call_operand.vmem [shape: bf16[8,128], index: 7, kind: output, shape index: {}]  }
   0x1   :  { %13 = vsyncpa [#allocation5], 0 }
   0x2   :  { %14 = vsyncpa [#allocation8], 0  ;;  %s1260_s24 = smov [#allocation4]   ;;  %s1166_s28 = scalar_lea.hbm %s1401_s1, 6272 }
   0x3   :  { %s30_s25 = sshll.u32 %s1260_s24, 4  ;;  %p1167_p0 = scmp.ne.s32.totalorder %s1401_s1, %s1166_s28  ;;  %s31_s25 = int_to_ptr.vmem [resolvable:$true] %s30_s25 }
   0x4   :  { %p1170_p1 = scmp.lt.u32.totalorder %s1166_s28, %s1401_s1 }
   0x6   :  { %p1172_p2 = pnand %p1170_p1, %p1167_p0 }
   0x8   :  { %1175 = shalt.err (!%p1172_p2)
}
   0x9   :  { %s1176_s10 = scalar_lea.vmem %s31_s25, 6272  ;;  %p1181_p4 = scmp.lt.s32.totalorder %s31_s25, %s31_s25 }
   0xa   :  { %p1177_p3 = scmp.ne.s32.totalorder %s31_s25, %s1176_s10  ;;  %p1182_p5 = scmp.lt.s32.totalorder %s1176_s10, %s1176_s10 }
   0xc   :  { %p1183_p6 = por %p1182_p5, %p1181_p4 }
   0xe   :  { %p1184_p7 = pnand %p1183_p6, %p1177_p3 }
  0x10   :  { %1187 = shalt.err (!%p1184_p7)
}
  0x11   :  { %s1261_s11 = smov 64   ;;  %s1262_s12 = smov 4  }
  0x12   :  { %36 = dma.hbm_to_vmem [thread:$0]  %s1401_s1, 6272, %s31_s25, [#allocation5], %s1261_s11, %s1261_s11, %s1262_s12  }
  0x13   :  { %s1263_s15 = smov [#allocation2]   ;;  %s1264_s17 = smov [#allocation6]  }
  0x14   :  { %s21_s16 = sshll.u32 %s1263_s15, 4  ;;  %s44_s18 = sshll.u32 %s1264_s17, 4  ;;  %s22_s16 = int_to_ptr.vmem [resolvable:$true] %s21_s16  ;;  %s45_s18 = int_to_ptr.vmem [resolvable:$true] %s44_s18 }
  0x15   :  { %s1188_s21 = scalar_lea.hbm %s1400_s0, 896 }
  0x16   :  { %p1189_p8 = scmp.ne.s32.totalorder %s1400_s0, %s1188_s21  ;;  %p1192_p9 = scmp.lt.u32.totalorder %s1188_s21, %s1400_s0 }
  0x18   :  { %p1194_p10 = pnand %p1192_p9, %p1189_p8 }
  0x1a   :  { %1197 = shalt.err (!%p1194_p10)
}
  0x1b   :  { %s1198_s1 = scalar_lea.vmem %s22_s16, 896  ;;  %p1203_p12 = scmp.lt.s32.totalorder %s22_s16, %s22_s16 }
  0x1c   :  { %p1199_p11 = scmp.ne.s32.totalorder %s22_s16, %s1198_s1  ;;  %p1204_p13 = scmp.lt.s32.totalorder %s1198_s1, %s1198_s1 }
  0x1e   :  { %p1205_p0 = por %p1204_p13, %p1203_p12 }
  0x20   :  { %p1206_p1 = pnand %p1205_p0, %p1199_p11 }
  0x22   :  { %1209 = shalt.err (!%p1206_p1)
}
  0x23   :  { %24 = dma.hbm_to_vmem [thread:$0]  %s1400_s0, 896, %s22_s16, [#allocation3]  }
  0x24   :  { %s1210_s30 = scalar_lea.hbm %s1403_s3, 1024 }
  0x25   :  { %p1211_p2 = scmp.ne.s32.totalorder %s1403_s3, %s1210_s30  ;;  %p1214_p3 = scmp.lt.u32.totalorder %s1210_s30, %s1403_s3 }
  0x27   :  { %p1216_p4 = pnand %p1214_p3, %p1211_p2 }
  0x29   :  { %1219 = shalt.err (!%p1216_p4)
}
  0x2a   :  { %s1220_s14 = scalar_lea.vmem %s45_s18, 1024  ;;  %p1225_p6 = scmp.lt.s32.totalorder %s45_s18, %s45_s18 }
  0x2b   :  { %p1221_p5 = scmp.ne.s32.totalorder %s45_s18, %s1220_s14  ;;  %p1226_p7 = scmp.lt.s32.totalorder %s1220_s14, %s1220_s14 }
  0x2d   :  { %p1227_p8 = por %p1226_p7, %p1225_p6 }
  0x2f   :  { %p1228_p9 = pnand %p1227_p8, %p1221_p5 }
  0x31   :  { %1231 = shalt.err (!%p1228_p9)
}
  0x32   :  { %50 = dma.hbm_to_vmem [thread:$0]  %s1403_s3, 1024, %s45_s18, [#allocation5], %s1261_s11, %s1261_s11, %s1262_s12  }
  0x33   :  { %s1265_s16 = smov [#allocation7]   ;;  %s1232_s21 = scalar_lea.hbm %s1405_s5, 1024 }
  0x34   :  { %s58_s17 = sshll.u32 %s1265_s16, 4  ;;  %p1233_p10 = scmp.ne.s32.totalorder %s1405_s5, %s1232_s21  ;;  %s59_s17 = int_to_ptr.vmem [resolvable:$true] %s58_s17 }
  0x35   :  { %p1236_p11 = scmp.lt.u32.totalorder %s1232_s21, %s1405_s5 }
  0x37   :  { %p1238_p12 = pnand %p1236_p11, %p1233_p10 }
  0x39   :  { %1241 = shalt.err (!%p1238_p12)
}
  0x3a   :  { %s1242_s1 = scalar_lea.vmem %s59_s17, 1024  ;;  %p1247_p0 = scmp.lt.s32.totalorder %s59_s17, %s59_s17 }
  0x3b   :  { %p1243_p13 = scmp.ne.s32.totalorder %s59_s17, %s1242_s1  ;;  %p1248_p1 = scmp.lt.s32.totalorder %s1242_s1, %s1242_s1 }
  0x3d   :  { %p1249_p2 = por %p1248_p1, %p1247_p0 }
  0x3f   :  { %p1250_p3 = pnand %p1249_p2, %p1243_p13 }
  0x41   :  { %1253 = shalt.err (!%p1250_p3)
}
  0x42   :  { %64 = dma.hbm_to_vmem [thread:$0]  %s1405_s5, 1024, %s59_s17, [#allocation8], %s1261_s11, %s1261_s11, %s1262_s12  }
  0x43   :  { %1254 = dma.done.wait [#allocation3], 896  }
  0x44   :  { %1255 = vsyncadd [#allocation3], 4294966400 }
  0x45   :  { %1256 = dma.done.wait [#allocation5], 7296  }
  0x46   :  { %1257 = vsyncadd [#allocation5], 4294960000 }
  0x47   :  { %1258 = dma.done.wait [#allocation8], 1024  }
  0x48   :  { %1259 = vsyncadd [#allocation8], 4294966272  ;;  %v1101_v0 = vld [vmem:[#allocation4 + $0x40] sm:$0xff]   ;;  %v1105_v4 = vld [vmem:[#allocation4 + $0x48] sm:$0xff]   ;;  %v1266_v44 = vmov 0.0   ;;  %vm1267_vm0 = vmmov 0  }
  0x49   :  { %v1102_v1 = vld [vmem:[#allocation4] sm:$0xff]   ;;  %961 = vmatprep.subr.bf16.mxu0 %v1101_v0  ;;  %v1106_v5 = vld [vmem:[#allocation4 + $0x8] sm:$0xff]   ;;  %v1109_v8 = vld [vmem:[#allocation4 + $0x50] sm:$0xff]   ;;  %vm493_vm1 = vcmask 130048  }
  0x4a   :  { %v1103_v2 = vld [vmem:[#allocation4 + $0xc0] sm:$0xff]   ;;  %962 = vmatpush3.bf16.msra.mxu0 %v1102_v1  ;;  %v1107_v6 = vld [vmem:[#allocation4 + $0xc8] sm:$0xff]   ;;  %v1110_v9 = vld [vmem:[#allocation4 + $0x10] sm:$0xff]  }
  0x4b   :  { %v1104_v3 = vld [vmem:[#allocation4 + $0x80] sm:$0xff]   ;;  %983 = vmatprep.subr.bf16.mxu1 %v1103_v2  ;;  %963 = vmatprep.subr.bf16.mxu0 %v1105_v4  ;;  %v1108_v7 = vld [vmem:[#allocation4 + $0x88] sm:$0xff]   ;;  %v1111_v10 = vld [vmem:[#allocation4 + $0xd0] sm:$0xff]  }
  0x4c   :  { %984 = vmatpush3.bf16.msra.mxu1 %v1104_v3  ;;  %v1112_v11 = vld [vmem:[#allocation4 + $0x90] sm:$0xff]   ;;  %v1113_v12 = vld [vmem:[#allocation4 + $0x58] sm:$0xff]   ;;  %v1117_v16 = vld [vmem:[#allocation4 + $0x60] sm:$0xff]  }
  0x4d   :  { %985 = vmatprep.subr.bf16.mxu1 %v1107_v6  ;;  %v1114_v13 = vld [vmem:[#allocation4 + $0x18] sm:$0xff]   ;;  %v1118_v17 = vld [vmem:[#allocation4 + $0x20] sm:$0xff]   ;;  %v1121_v20 = vld [vmem:[#allocation4 + $0x68] sm:$0xff]  }
  0x4e   :  { %964 = vmatpush3.bf16.msra.mxu0 %v1106_v5  ;;  %v1115_v14 = vld [vmem:[#allocation4 + $0xd8] sm:$0xff]   ;;  %v1119_v18 = vld [vmem:[#allocation4 + $0xe0] sm:$0xff]   ;;  %v1122_v21 = vld [vmem:[#allocation4 + $0x28] sm:$0xff]  }
  0x4f   :  { %965 = vmatprep.subr.bf16.mxu0 %v1109_v8  ;;  %v1116_v15 = vld [vmem:[#allocation4 + $0x98] sm:$0xff]   ;;  %v1120_v19 = vld [vmem:[#allocation4 + $0xa0] sm:$0xff]   ;;  %v1123_v22 = vld [vmem:[#allocation4 + $0xe8] sm:$0xff]  }
  0x50   :  { %986 = vmatpush3.bf16.msra.mxu1 %v1108_v7  ;;  %v1124_v23 = vld [vmem:[#allocation4 + $0xa8] sm:$0xff]   ;;  %v1125_v24 = vld [vmem:[#allocation4 + $0x70] sm:$0xff]   ;;  %v1129_v28 = vld [vmem:[#allocation4 + $0x78] sm:$0xff]  }
  0x51   :  { %987 = vmatprep.subr.bf16.mxu1 %v1111_v10  ;;  %v1126_v25 = vld [vmem:[#allocation4 + $0x30] sm:$0xff]   ;;  %v1130_v29 = vld [vmem:[#allocation4 + $0x38] sm:$0xff]   ;;  %v80_v34 = vld [vmem:[#allocation2] sm:$0xff] }
  0x52   :  { %966 = vmatpush3.bf16.msra.mxu0 %v1110_v9  ;;  %v1127_v26 = vld [vmem:[#allocation4 + $0xf0] sm:$0xff]   ;;  %v1131_v30 = vld [vmem:[#allocation4 + $0xf8] sm:$0xff]   ;;  %v87_v35 = vpack.c.bf16 %v80_v34, %v80_v34  ;;  %v1133_v36 = vld [vmem:[#allocation4 + $0x140] sm:$0xff]  }
  0x53   :  { %967 = vmatprep.subr.bf16.mxu0 %v1113_v12  ;;  %v1128_v27 = vld [vmem:[#allocation4 + $0xb0] sm:$0xff]   ;;  %v1132_v33 = vld [vmem:[#allocation4 + $0xb8] sm:$0xff]   ;;  %v83_v37 = vld [vmem:[#allocation2 + $0x18] sm:$0xff] }
  0x54   :  { %988 = vmatpush3.bf16.msra.mxu1 %v1112_v11  ;;  %v81_v31 = vld [vmem:[#allocation2 + $0x8] sm:$0xff]  ;;  %v90_v38 = vpack.c.bf16 %v83_v37, %v83_v37  ;;  %v1134_v39 = vld [vmem:[#allocation4 + $0x100] sm:$0xff]   ;;  %v82_v40 = vld [vmem:[#allocation2 + $0x10] sm:$0xff] }
  0x55   :  { %989 = vmatprep.subr.bf16.mxu1 %v1115_v14  ;;  %v88_v32 = vpack.c.bf16 %v81_v31, %v81_v31  ;;  %v89_v41 = vpack.c.bf16 %v82_v40, %v82_v40  ;;  %v1135_v42 = vld [vmem:[#allocation4 + $0x148] sm:$0xff]   ;;  %v1137_v45 = vld [vmem:[#allocation4 + $0x150] sm:$0xff]   ;;  %v1139_v47 = vld [vmem:[#allocation4 + $0x158] sm:$0xff]  }
  0x56   :  { %968 = vmatpush3.bf16.msra.mxu0 %v1114_v13  ;;  %569 = vmatprep.mubr.bf16.mxu1 %v90_v38  ;;  %v1136_v43 = vld [vmem:[#allocation4 + $0x108] sm:$0xff]   ;;  %v1138_v46 = vld [vmem:[#allocation4 + $0x110] sm:$0xff]   ;;  %v1140_v48 = vld [vmem:[#allocation4 + $0x118] sm:$0xff]  }
  0x57   :  { %969 = vmatprep.subr.bf16.mxu0 %v1117_v16  ;;  %529 = vmatprep.mubr.bf16.mxu0 %v88_v32  ;;  %v1141_v49 = vld [vmem:[#allocation4 + $0x160] sm:$0xff]   ;;  %v1143_v51 = vld [vmem:[#allocation4 + $0x168] sm:$0xff]   ;;  %v85_v54 = vld [vmem:[#allocation2 + $0x28] sm:$0xff] }
  0x58   :  { %990 = vmatpush3.bf16.msra.mxu1 %v1116_v15  ;;  %v1142_v50 = vld [vmem:[#allocation4 + $0x120] sm:$0xff]   ;;  %v1144_v52 = vld [vmem:[#allocation4 + $0x128] sm:$0xff]   ;;  %v1145_v55 = vld [vmem:[#allocation4 + $0x170] sm:$0xff]   ;;  %v92_v56 = vpack.c.bf16 %v85_v54, %v85_v54 }
  0x59   :  { %991 = vmatprep.subr.bf16.mxu1 %v1119_v18  ;;  %v1149_v53 = vld [vmem:[#allocation4 + $0x180] sm:$0xff]   ;;  %v86_v57 = vld [vmem:[#allocation2 + $0x30] sm:$0xff]  ;;  %v1146_v59 = vld [vmem:[#allocation4 + $0x130] sm:$0xff]  }
  0x5a   :  { %970 = vmatpush3.bf16.msra.mxu0 %v1118_v17  ;;  %v93_v58 = vpack.c.bf16 %v86_v57, %v86_v57  ;;  %v1147_v60 = vld [vmem:[#allocation4 + $0x178] sm:$0xff]   ;;  %v84_v62 = vld [vmem:[#allocation2 + $0x20] sm:$0xff]  ;;  %v1151_v1 = vld [vmem:[#allocation6 + $0x8] sm:$0xff]  }
  0x5b   :  { %971 = vmatprep.subr.bf16.mxu0 %v1121_v20  ;;  %v1148_v61 = vld [vmem:[#allocation4 + $0x138] sm:$0xff]   ;;  %v91_v63 = vpack.c.bf16 %v84_v62, %v84_v62  ;;  %v1150_v0 = vld [vmem:[#allocation6] sm:$0xff]   ;;  %v1153_v3 = vld [vmem:[#allocation6 + $0x18] sm:$0xff]  }
  0x5c   :  { %992 = vmatpush3.bf16.msra.mxu1 %v1120_v19  ;;  %v1152_v2 = vld [vmem:[#allocation6 + $0x10] sm:$0xff]   ;;  %v1154_v4 = vld [vmem:[#allocation6 + $0x20] sm:$0xff]   ;;  %v1155_v5 = vld [vmem:[#allocation6 + $0x28] sm:$0xff]  }
  0x5d   :  { %993 = vmatprep.subr.bf16.mxu1 %v1123_v22  ;;  %v1156_v6 = vld [vmem:[#allocation6 + $0x30] sm:$0xff]   ;;  %v1157_v7 = vld [vmem:[#allocation6 + $0x38] sm:$0xff]   ;;  %v1158_v8 = vld [vmem:[#allocation7] sm:$0xff]  }
  0x5e   :  { %972 = vmatpush3.bf16.msra.mxu0 %v1122_v21  ;;  %v1159_v9 = vld [vmem:[#allocation7 + $0x8] sm:$0xff]   ;;  %v1160_v10 = vld [vmem:[#allocation7 + $0x10] sm:$0xff]   ;;  %v1161_v11 = vld [vmem:[#allocation7 + $0x18] sm:$0xff]  }
  0x5f   :  { %973 = vmatprep.subr.bf16.mxu0 %v1125_v24  ;;  %v1162_v12 = vld [vmem:[#allocation7 + $0x20] sm:$0xff]   ;;  %v1163_v13 = vld [vmem:[#allocation7 + $0x28] sm:$0xff]   ;;  %v1164_v40 = vld [vmem:[#allocation7 + $0x30] sm:$0xff]  }
  0x60   :  { %994 = vmatpush3.bf16.msra.mxu1 %v1124_v23  ;;  %v892_v15 = vld [vmem:[%s1402_s2] ss:$0 sm:$0xff] }
  0x61   :  { %995 = vmatprep.subr.bf16.mxu1 %v1127_v26 }
  0x62   :  { %974 = vmatpush3.bf16.msra.mxu0 %v1126_v25 }
  0x63   :  { %975 = vmatprep.subr.bf16.mxu0 %v1129_v28 }
  0x64   :  { %996 = vmatpush3.bf16.msra.mxu1 %v1128_v27 }
  0x65   :  { %997 = vmatprep.subr.bf16.mxu1 %v1131_v30 }
  0x66   :  { %976 = vmatpush3.bf16.msra.mxu0 %v1130_v29 }
  0x67   :  { %1005 = vmatprep.subr.bf16.mxu0 %v1133_v36 }
  0x68   :  { %998 = vmatpush3.bf16.msra.mxu1 %v1132_v33 }
  0x69   :  { %530 = vmatmul.mubr.bf16.vlgmr.msra.gmra.mrb[0].mxu0 %v87_v35  ;;  %1047 = vmatprep.subr.bf16.mxu1 %v1266_v44 }
  0x6a   :  { %1006 = vmatpush3.bf16.msra.mxu0 %v1134_v39  ;;  %609 = vmatprep.mubr.bf16.mxu0 %v92_v56 }
  0x6b   :  { %570 = vmatmul.mubr.bf16.vlgmr.msra.gmra.mrb[0].mxu1 %v89_v41  ;;  %1007 = vmatprep.subr.bf16.mxu0 %v1135_v42  ;;  %v1165_v41 = vld [vmem:[#allocation7 + $0x38] sm:$0xff]   ;;  %v943_v42 = vld [vmem:[%s1404_s4] ss:$0 sm:$0xff] }
  0x6c   :  { %1049 = vmatprep.mubr.msk.bf16.mxu1 %vm1267_vm0, %v1266_v44  ;;  %1048 = vmatpush3.bf16.msra.mxu1 %v1149_v53 }
  0x6d   :  { %1053 = vmatprep.subr.bf16.mxu1 %v1266_v44 }
  0x6e   :  { %1008 = vmatpush3.bf16.msra.mxu0 %v1136_v43 }
  0x6f   :  { %1009 = vmatprep.subr.bf16.mxu0 %v1137_v45 }
  0x72   :  { %1010 = vmatpush3.bf16.msra.mxu0 %v1138_v46 }
  0x73   :  { %1011 = vmatprep.subr.bf16.mxu0 %v1139_v47  ;;  %1050 = vmatmul.mubr.msk.bf16.vlgmr.msra.gmra.mrb[4].mxu1 %vm493_vm1, %v93_v58 }
  0x74   :  { %1069 = vmatprep.mubr.msk.bf16.mxu1 %vm1267_vm0, %v1266_v44  ;;  %1054 = vmatpush3.bf16.msra.mxu1 %v1150_v0 }
  0x75   :  { %1055 = vmatprep.subr.bf16.mxu1 %v1266_v44 }
  0x76   :  { %1012 = vmatpush3.bf16.msra.mxu0 %v1140_v48 }
  0x77   :  { %1013 = vmatprep.subr.bf16.mxu0 %v1141_v49 }
  0x78   :  { %1056 = vmatpush3.bf16.msra.mxu1 %v1151_v1 }
  0x79   :  { %1057 = vmatprep.subr.bf16.mxu1 %v1266_v44 }
  0x7a   :  { %1014 = vmatpush3.bf16.msra.mxu0 %v1142_v50 }
  0x7b   :  { %1015 = vmatprep.subr.bf16.mxu0 %v1143_v51  ;;  %v952_v51 = vld [vmem:[%s1406_s6] ss:$0 sm:$0xff] }
  0x7c   :  { %1058 = vmatpush3.bf16.msra.mxu1 %v1152_v2 }
  0x7d   :  { %1059 = vmatprep.subr.bf16.mxu1 %v1266_v44 }
  0x7e   :  { %1016 = vmatpush3.bf16.msra.mxu0 %v1144_v52 }
  0x7f   :  { %1017 = vmatprep.subr.bf16.mxu0 %v1145_v55 }
  0x80   :  { %1060 = vmatpush3.bf16.msra.mxu1 %v1153_v3 }
  0x81   :  { %1061 = vmatprep.subr.bf16.mxu1 %v1266_v44 }
  0x82   :  { %1018 = vmatpush3.bf16.msra.mxu0 %v1146_v59 }
  0x83   :  { %1019 = vmatprep.subr.bf16.mxu0 %v1147_v60 }
  0x84   :  { %1062 = vmatpush3.bf16.msra.mxu1 %v1154_v4 }
  0x85   :  { %1063 = vmatprep.subr.bf16.mxu1 %v1266_v44 }
  0x86   :  { %1020 = vmatpush3.bf16.msra.mxu0 %v1148_v61 }
  0x87   :  { %1073 = vmatprep.subr.bf16.mxu0 %v1266_v44 }
  0x88   :  { %1064 = vmatpush3.bf16.msra.mxu1 %v1155_v5 }
  0x89   :  { %610 = vmatmul.mubr.bf16.vlgmr.msra.gmra.mrb[4].mxu0 %v91_v63  ;;  %1065 = vmatprep.subr.bf16.mxu1 %v1266_v44 }
  0x8a   :  { %1089 = vmatprep.mubr.msk.bf16.mxu0 %vm1267_vm0, %v1266_v44  ;;  %1074 = vmatpush3.bf16.msra.mxu0 %v1158_v8 }
  0x8b   :  { %1075 = vmatprep.subr.bf16.mxu0 %v1266_v44 }
  0x8c   :  { %1066 = vmatpush3.bf16.msra.mxu1 %v1156_v6 }
  0x8d   :  { %1067 = vmatprep.subr.bf16.mxu1 %v1266_v44 }
  0x8e   :  { %1076 = vmatpush3.bf16.msra.mxu0 %v1159_v9 }
  0x8f   :  { %1077 = vmatprep.subr.bf16.mxu0 %v1266_v44 }
  0x90   :  { %1068 = vmatpush3.bf16.msra.mxu1 %v1157_v7 }
  0x92   :  { %1078 = vmatpush3.bf16.msra.mxu0 %v1160_v10 }
  0x93   :  { %1079 = vmatprep.subr.bf16.mxu0 %v1266_v44 }
  0x96   :  { %1080 = vmatpush3.bf16.msra.mxu0 %v1161_v11 }
  0x97   :  { %1081 = vmatprep.subr.bf16.mxu0 %v1266_v44 }
  0x9a   :  { %1082 = vmatpush3.bf16.msra.mxu0 %v1162_v12 }
  0x9b   :  { %1083 = vmatprep.subr.bf16.mxu0 %v1266_v44 }
  0x9e   :  { %1084 = vmatpush3.bf16.msra.mxu0 %v1163_v13 }
  0x9f   :  { %1085 = vmatprep.subr.bf16.mxu0 %v1266_v44 }
  0xa2   :  { %1086 = vmatpush3.bf16.msra.mxu0 %v1164_v40 }
  0xa3   :  { %1087 = vmatprep.subr.bf16.mxu0 %v1266_v44 }
  0xa6   :  { %1088 = vmatpush3.bf16.msra.mxu0 %v1165_v41 }
 0x13c   :  { %v977_v14 = vpop.f32.mrb[0].mxu0 }
 0x13d   :  { %v978_v16 = vpop.f32.mrb[1].mxu0 }
 0x13e   :  { %v979_v17 = vadd.f32 %v978_v16, %v977_v14  ;;  %v980_v18 = vpop.f32.mrb[2].mxu0  ;;  %v999_v19 = vpop.f32.mrb[0].mxu1 }
 0x13f   :  { %v981_v20 = vpop.f32.mrb[3].mxu0  ;;  %v1000_v22 = vpop.f32.mrb[1].mxu1 }
 0x140   :  { %v532_v21 = vadd.f32 %v979_v17, %v892_v15  ;;  %v1001_v23 = vadd.f32 %v1000_v22, %v999_v19  ;;  %v1002_v24 = vpop.f32.mrb[2].mxu1 }
 0x141   :  { %v1003_v25 = vpop.f32.mrb[3].mxu1 }
 0x142   :  { %v572_v26 = vadd.f32 %v1001_v23, %v532_v21 }
 0x146   :  { %v651_v27 = vpop.f32.mrb[4].mxu1 }
 0x147   :  { %v1051_v28 = vpop.f32.mrb[5].mxu1 }
 0x148   :  { %v654_v29 = vpop.f32.mrb[6].mxu1 }
 0x149   :  { %v1052_v30 = vpop.f32.mrb[7].mxu1 }
 0x15c   :  { %v1021_v31 = vpop.f32.mrb[4].mxu0 }
 0x15d   :  { %v1022_v32 = vpop.f32.mrb[5].mxu0 }
 0x15e   :  { %v1023_v33 = vadd.f32 %v1022_v32, %v1021_v31  ;;  %v1024_v34 = vpop.f32.mrb[6].mxu0 }
 0x15f   :  { %v1025_v35 = vpop.f32.mrb[7].mxu0 }
 0x160   :  { %v612_v36 = vadd.f32 %v1023_v33, %v572_v26 }
 0x162   :  { %v652_v37 = vadd.f32 %v651_v27, %v612_v36 }
 0x164   :  { %v657_v38 = vmax.f32 %v652_v37, 0.0 }
 0x166   :  { %v658_v39 = vpack.c.bf16 %v657_v38, %v657_v38 }
 0x168   :  { %1070 = vmatmul.mubr.bf16.vlgmr.msra.gmra.mrb[8].mxu1 %v658_v39 }
 0x23b   :  { %v764_v43 = vpop.f32.mrb[8].mxu1 }
 0x23c   :  { %v765_v45 = vadd.f32 %v943_v42, %v764_v43  ;;  %v1071_v46 = vpop.f32.mrb[9].mxu1 }
 0x23d   :  { %v767_v47 = vpop.f32.mrb[10].mxu1 }
 0x23e   :  { %v770_v48 = vmax.f32 %v765_v45, 0.0  ;;  %v1072_v49 = vpop.f32.mrb[11].mxu1 }
 0x240   :  { %v771_v50 = vpack.c.bf16 %v770_v48, %v770_v48 }
 0x242   :  { %1090 = vmatmul.mubr.bf16.vlgmr.msra.gmra.mrb[8].mxu0 %v771_v50 }
 0x315   :  { %v877_v52 = vpop.f32.mrb[8].mxu0 }
 0x316   :  { %v878_v44 = vadd.f32 %v952_v51, %v877_v52  ;;  %v1091_v53 = vpop.f32.mrb[9].mxu0 }
 0x317   :  { %v880_v54 = vpop.f32.mrb[10].mxu0 }
 0x318   :  { %v883_v55 = vpack.c.bf16 %v878_v44, %v878_v44  ;;  %v1092_v56 = vpop.f32.mrb[11].mxu0 }
 0x31a   :  { %884 = vst [vmem:[%s1407_s7] sm:$0xf] %v883_v55 }
 0x31b   :  { %889 = vsyncpa [#allocation3], 1 }
 0x31c   :  { %890 = vsyncpa [#allocation5], 1 }
 0x31d   :  { %891 = vsyncpa [#allocation8], 1 }

</bundles_post_ra>
